<compile_context>
chip_gen: v5e
topology: v5e:2x2
jax: 0.10.0
libtpu: 0.0.40
codegen_flags: <defaults>
</compile_context>

<pallas_src>
import jax
import jax.numpy as jnp
from jax.experimental import pallas as pl
from jax.experimental.pallas import tpu as pltpu


# --------------------------------------------------------------------------
# Kernel bodies (closures so the dtype / precision policy is static)
# --------------------------------------------------------------------------
def _make_identity_kernel(out_dtype, upcast):
    # Identity residual branch:  out = x + gamma * x = (1 + gamma) * x
    # Single HBM read of x instead of two.
    def kernel(gamma_ref, x_ref, o_ref):
        g = gamma_ref[0]                                  # f32 scalar in SMEM
        x = x_ref[...]
        if upcast:
            y = x.astype(jnp.float32) * (1.0 + g)
        else:
            y = x * (1.0 + g).astype(x.dtype)             # bf16-native on v6e/v7x
        o_ref[...] = y.astype(out_dtype)
    return kernel


def _make_fused_branch_kernel(out_dtype, upcast, residual_fn):
    # out = x + gamma * residual_fn(x), branch computed per-tile in VMEM
    # (residual(x) never touches HBM).  residual_fn must be tile-local
    # (elementwise), e.g. an activation.
    def kernel(gamma_ref, x_ref, o_ref):
        g = gamma_ref[0]
        x = x_ref[...]
        if upcast:
            x32 = x.astype(jnp.float32)
            y = x32 + g * residual_fn(x32)
        else:
            y = x + g.astype(x.dtype) * residual_fn(x)
        o_ref[...] = y.astype(out_dtype)
    return kernel


def _make_two_input_kernel(out_dtype, upcast):
    # General path: residual(x) was produced elsewhere and lives in HBM.
    def kernel(gamma_ref, x_ref, r_ref, o_ref):
        g = gamma_ref[0]
        x = x_ref[...]
        r = r_ref[...]
        if upcast:
            y = x.astype(jnp.float32) + g * r.astype(jnp.float32)
        else:
            y = x + g.astype(x.dtype) * r
        o_ref[...] = y.astype(out_dtype)
    return kernel


# --------------------------------------------------------------------------
# Per-generation planning
# --------------------------------------------------------------------------
_LANE_CANDIDATES = (4096, 2048, 1024, 512, 256, 128)


def _chip_kind():
    try:
        return jax.devices()[0].device_kind.lower()
    except Exception:
        return ""


def _tile_plan_for_chip(kind, num_streams):
    """Per-buffer tile byte budget + explicit VMEM limit (or None for default)."""
    if "v5" in kind:
        # Stay inside v5e's 16 MiB scoped-VMEM default:
        # num_streams * 2 buffers * 2 MiB <= 12 MiB.
        return 2 * 1024 * 1024, None
    # v6e / v7x (and unknown): larger tiles to shrink per-step overhead at
    # high HBM bandwidth.  3 streams * 2 buffers * 4 MiB = 24 MiB < 48 MiB
    # limit < v7x's 64 MiB physical VMEM.
    return 4 * 1024 * 1024, 48 * 1024 * 1024


def _plan(total, dtype_bytes, tile_bytes):
    """Pick (lanes, rows, tile_rows, grid) for a 128-divisible element count."""
    lanes = None
    for cand in _LANE_CANDIDATES:
        if total % cand == 0 and total // cand >= 8:      # prefer full sublanes
            lanes = cand
            break
    if lanes is None:                                      # tiny tensor
        lanes = 128
    rows = total // lanes

    tile_elems = max(lanes * 8, tile_bytes // dtype_bytes)
    tile_rows = max(8, (tile_elems // lanes) // 8 * 8)
    if tile_rows >= rows:
        if rows >= 16:
            # Guarantee >=2 grid steps so v7x's two TensorCores both get work.
            tile_rows = max(8, (rows // 2) // 8 * 8)
        else:
            tile_rows = rows                               # full-extent block
    grid = pl.cdiv(rows, tile_rows)                        # trailing block masked
    return lanes, rows, tile_rows, grid


# --------------------------------------------------------------------------
# pallas_call helpers
# --------------------------------------------------------------------------
def _slab_call(kernel, inputs_2d, rows, lanes, tile_rows, grid, out_dtype,
               gamma32, vmem_limit):
    block = pl.BlockSpec((tile_rows, lanes), lambda i: (i, 0))
    in_specs = [pl.BlockSpec(memory_space=pltpu.SMEM)] + [block] * len(inputs_2d)
    cp_kwargs = dict(dimension_semantics=("parallel",))
    if vmem_limit is not None:
        cp_kwargs["vmem_limit_bytes"] = vmem_limit
    return pl.pallas_call(
        kernel,
        out_shape=jax.ShapeDtypeStruct((rows, lanes), out_dtype),
        grid_spec=pltpu.PrefetchScalarGridSpec(
            num_scalar_prefetch=0,
            grid=(grid,),
            in_specs=in_specs,
            out_specs=block,
        ),
        compiler_params=pltpu.CompilerParams(**cp_kwargs),
    )(gamma32, *inputs_2d)


def _tail_call(kernel, inputs_2d, rem, out_dtype, gamma32):
    # Tiny single-block call for a <128-element remainder (full-extent block).
    block = pl.BlockSpec((1, rem), lambda i: (0, 0))
    in_specs = [pl.BlockSpec(memory_space=pltpu.SMEM)] + [block] * len(inputs_2d)
    return pl.pallas_call(
        kernel,
        out_shape=jax.ShapeDtypeStruct((1, rem), out_dtype),
        grid_spec=pltpu.PrefetchScalarGridSpec(
            num_scalar_prefetch=0,
            grid=(1,),
            in_specs=in_specs,
            out_specs=block,
        ),
    )(gamma32, *inputs_2d)


def _elementwise_streaming(kernel, tensors, gamma, out_dtype, num_streams):
    """Stream `kernel(gamma_ref, *tensor_refs, o_ref)` over flattened tensors."""
    orig_shape = tensors[0].shape
    total = tensors[0].size
    gamma32 = jnp.asarray(gamma, jnp.float32).reshape(-1)

    kind = _chip_kind()
    tile_bytes, vmem_limit = _tile_plan_for_chip(kind, num_streams)
    dtype_bytes = jnp.dtype(tensors[0].dtype).itemsize

    flats = [t.reshape(-1) for t in tensors]
    main_total = (total // 128) * 128
    rem = total - main_total

    pieces = []
    if main_total:
        lanes, rows, tile_rows, grid = _plan(main_total, dtype_bytes, tile_bytes)
        prefixes = [f if rem == 0 else f[:main_total] for f in flats]
        ins2d = [p.reshape(rows, lanes) for p in prefixes]
        out2d = _slab_call(kernel, ins2d, rows, lanes, tile_rows, grid,
                           out_dtype, gamma32, vmem_limit)
        pieces.append(out2d.reshape(-1))
    if rem:
        tails = [f[main_total:].reshape(1, rem) for f in flats]
        out_t = _tail_call(kernel, tails, rem, out_dtype, gamma32)
        pieces.append(out_t.reshape(-1))

    out_flat = pieces[0] if len(pieces) == 1 else jnp.concatenate(pieces)
    return out_flat.reshape(orig_shape)


def _should_upcast(dtype, kind):
    if dtype == jnp.float32:
        return True
    # Sub-f32 dtypes: keep the f32 path on v5 (VPU has no bf16); native elsewhere.
    return "v5" in kind


# --------------------------------------------------------------------------
# Public wrappers
# --------------------------------------------------------------------------
def residual_identity_forward(x, gamma):
    """out = (1 + gamma) * x  — identity-branch specialization (single HBM read)."""
    upcast = _should_upcast(x.dtype, _chip_kind())
    kernel = _make_identity_kernel(x.dtype, upcast)
    return _elementwise_streaming(kernel, [x], gamma, x.dtype, num_streams=2)


def residual_forward_fused(x, gamma, residual_fn):
    """out = x + gamma * residual_fn(x), with the (tile-local / elementwise)
    branch fused into the kernel so residual(x) never hits HBM."""
    upcast = _should_upcast(x.dtype, _chip_kind())
    kernel = _make_fused_branch_kernel(x.dtype, upcast, residual_fn)
    return _elementwise_streaming(kernel, [x], gamma, x.dtype, num_streams=2)


def residual_forward(x, residual_out, gamma):
    """out = x + gamma * residual_out (general two-input path, branch computed
    elsewhere)."""
    assert x.shape == residual_out.shape and x.dtype == residual_out.dtype
    upcast = _should_upcast(x.dtype, _chip_kind())
    kernel = _make_two_input_kernel(x.dtype, upcast)
    return _elementwise_streaming(kernel, [x, residual_out], gamma, x.dtype,
                                  num_streams=3)


def residual_module_apply(x, gamma, residual_fn=None):
    """Residual.forward.

    With the default (empty) nn.Sequential branch residual(x) == x, so we use
    the single-read identity specialization.  If an elementwise branch fn is
    supplied, it is fused into the kernel.
    # TODO(synk): non-elementwise branches (convs, norms from Residual(*layers))
    # must be computed outside (plain JAX or their own kernels); feed their
    # output into residual_forward(x, residual_out, gamma).
    """
    if residual_fn is None:
        return residual_identity_forward(x, gamma)
    return residual_forward_fused(x, gamma, residual_fn)


# --------------------------------------------------------------------------
# Test
# --------------------------------------------------------------------------
if __name__ == "__main__":
    key = jax.random.PRNGKey(0)
    N, C, H, W = 2, 4, 16, 16
    x = jax.random.normal(key, (N, C, H, W), dtype=jnp.float32)

    # Parameter init exactly as the module: gamma = zeros(1).
    gamma = jnp.zeros((1,), dtype=jnp.float32)
    out = jax.block_until_ready(residual_module_apply(x, gamma))
    ref = x + gamma[0] * x
    assert out.shape == (N, C, H, W)
    assert jnp.allclose(out, ref, atol=1e-6), "mismatch (gamma=0, identity)"

    # Nonzero gamma on the identity-branch path.
    gamma2 = jnp.full((1,), 0.25, dtype=jnp.float32)
    out2 = jax.block_until_ready(residual_module_apply(x, gamma2))
    ref2 = x + 0.25 * x
    assert jnp.allclose(out2, ref2, atol=1e-6), "mismatch (gamma=0.25, identity)"

    # Fused elementwise residual branch (no HBM materialization of residual(x)).
    out3 = jax.block_until_ready(residual_module_apply(x, gamma2, jnp.tanh))
    ref3 = x + 0.25 * jnp.tanh(x)
    assert jnp.allclose(out3, ref3, atol=1e-5), "mismatch (fused branch)"

    # General two-input path (branch computed outside the kernel).
    r = jnp.tanh(x)
    out4 = jax.block_until_ready(residual_forward(x, r, gamma2))
    assert jnp.allclose(out4, ref3, atol=1e-5), "mismatch (two-input)"

    # Non-128-divisible element count: prefix slab + tiny tail kernel, no pad.
    x_odd = jax.random.normal(jax.random.PRNGKey(1), (3, 67), dtype=jnp.float32)
    out5 = jax.block_until_ready(residual_module_apply(x_odd, gamma2))
    ref5 = x_odd + 0.25 * x_odd
    assert jnp.allclose(out5, ref5, atol=1e-6), "mismatch (misaligned tail)"

    # bf16 input exercises the native-dtype (or v5 upcast) math path.
    x_bf = x.astype(jnp.bfloat16)
    out6 = jax.block_until_ready(residual_module_apply(x_bf, gamma2))
    ref6 = (x_bf.astype(jnp.float32) * 1.25).astype(jnp.bfloat16)
    assert jnp.allclose(out6.astype(jnp.float32), ref6.astype(jnp.float32),
                        atol=2e-2), "mismatch (bf16)"

    print("KERNEL_OK")
</pallas_src>

<mosaic_0001>
module attributes {stable_mosaic.version = 11 : i64} {
  func.func @kernel(%arg0: i32, %arg1: memref<1xf32, #tpu.memory_space<smem>>, %arg2: memref<8x256xf32, #tpu.memory_space<vmem>>, %arg3: memref<8x256xf32, #tpu.memory_space<vmem>>) attributes {dimension_semantics = [#tpu.dimension_semantics<parallel>], iteration_bounds = array<i64: 1>, scalar_prefetch = 0 : i64, scratch_operands = 0 : i64, tpu.core_type = #tpu.core_type<tc>, window_params = [{transform_indices = @transform_0, window_bounds = array<i64: 1>}, {transform_indices = @transform_1, window_bounds = array<i64: 8, 256>}, {transform_indices = @transform_2, window_bounds = array<i64: 8, 256>}]} {
    %c0 = arith.constant 0 : index
    %0 = memref.load %arg1[%c0] : memref<1xf32, #tpu.memory_space<smem>>
    %c0_0 = arith.constant 0 : index
    %c0_1 = arith.constant 0 : index
    %1 = vector.load %arg2[%c0_0, %c0_1] : memref<8x256xf32, #tpu.memory_space<vmem>>, vector<8x256xf32>
    %cst = arith.constant 1.000000e+00 : f32
    %2 = arith.addf %cst, %0 : f32
    %3 = vector.broadcast %2 : f32 to vector<8x256xf32>
    %4 = arith.mulf %1, %3 : vector<8x256xf32>
    %c0_2 = arith.constant 0 : index
    %c0_3 = arith.constant 0 : index
    %5 = vector.load %arg3[%c0_2, %c0_3] : memref<8x256xf32, #tpu.memory_space<vmem>>, vector<8x256xf32>
    tpu.vector_store %arg3[%c0_2, %c0_3], %4 {strides = array<i32>} : memref<8x256xf32, #tpu.memory_space<vmem>>, vector<8x256xf32>,
    return
  }
  func.func @transform_0(%arg0: i32) -> i32 {
    %c0_i32 = arith.constant 0 : i32
    %c0_i32_0 = arith.constant 0 : i32
    return %c0_i32 : i32
  }
  func.func @transform_1(%arg0: i32) -> (i32, i32) {
    %c0_i32 = arith.constant 0 : i32
    %c0_i32_0 = arith.constant 0 : i32
    return %arg0, %c0_i32 : i32, i32
  }
  func.func @transform_2(%arg0: i32) -> (i32, i32) {
    %c0_i32 = arith.constant 0 : i32
    %c0_i32_0 = arith.constant 0 : i32
    return %arg0, %c0_i32 : i32, i32
  }
}

</mosaic_0001>

<bundles_post_ra>
// kernel: tpu_custom_call.1
= control target key start
LH: loop header
LB: loop body
LE: loop exit
PB: predicated region body
PF: predicated region fallthrough
CT: control target
= control target key end

     0   :  { %8 = vsyncpa [#allocation4], 0  ;;  %s133_s0 = inlined_call_operand.<no memory space> [shape: f32[1], index: 0, kind: input, shape index: {}]   ;;  %s134_s1 = inlined_call_operand.hbm [shape: f32[8,256], index: 1, kind: input, shape index: {}]   ;;  %s135_s2 = inlined_call_operand.hbm [shape: f32[8,256], index: 2, kind: output, shape index: {}]  }
   0x1   :  { %9 = vsyncpa [#allocation5], 0  ;;  %s17_s11 = sshll.u32 %s134_s1, 4  ;;  %s107_s12 = smov [#allocation3]   ;;  %s18_s11 = int_to_ptr.hbm [resolvable:$true] %s17_s11 }
   0x2   :  { %s19_s13 = sshll.u32 %s107_s12, 4  ;;  %s20_s13 = int_to_ptr.vmem [resolvable:$true] %s19_s13 }
   0x3   :  { %22 = dma.hbm_to_vmem [thread:$0]  %s18_s11, 256, %s20_s13, [#allocation4]  }
   0x4   :  { %103 = dma.done.wait [#allocation4], 256  }
   0x5   :  { %104 = vsyncadd [#allocation4], 4294967040  ;;  %s30_s16 = sadd.f32 1.0, %s133_s0  ;;  %s108_s17 = smov [#allocation6]   ;;  %v28_v1 = vld [vmem:[#allocation3] sm:$0xff]  ;;  %v29_v2 = vld [vmem:[#allocation3 + $0x8] sm:$0xff] }
   0x6   :  { %s41_s18 = sshll.u32 %s108_s17, 4  ;;  %s43_s21 = sshll.u32 %s135_s2, 4  ;;  %s42_s18 = int_to_ptr.vmem [resolvable:$true] %s41_s18  ;;  %s44_s21 = int_to_ptr.hbm [resolvable:$true] %s43_s21 }
   0x7   :  { %v31_v0 = vstv %s30_s16 }
   0x8   :  { %v32_v3 = vmul.f32 %v31_v0, %v28_v1  ;;  %v33_v4 = vmul.f32 %v31_v0, %v29_v2 }
   0xa   :  { %34 = vst [vmem:[#allocation6] sm:$0xff] %v32_v3 }
   0xb   :  { %35 = vst [vmem:[#allocation6 + $0x8] sm:$0xff] %v33_v4 }
   0xc   :  { %46 = dma.vmem_to_hbm [thread:$0]  %s42_s18, 256, %s44_s21, [#allocation5]  }
   0xd   :  { %105 = dma.done.wait [#allocation5], 256  }
   0xe   :  { %106 = vsyncadd [#allocation5], 4294967040 }
   0xf   :  { %51 = vsyncpa [#allocation4], 1 }
  0x10   :  { %52 = vsyncpa [#allocation5], 1 }

</bundles_post_ra>
